<compile_context>
chip_gen: v5e
topology: v5e:2x2
jax: 0.10.0
libtpu: 0.0.40
codegen_flags: <defaults>
</compile_context>

<pallas_src>
import jax
import jax.numpy as jnp
from jax.experimental import pallas as pl
from jax.experimental.pallas import tpu as pltpu


# ----------------------------- Pallas kernel --------------------------------
def _cheb_kernel(l_ref, x_ref, w_ref, b_ref, o_ref, r_ref):
    """One row-tile of the fused ChebConv.

    l_ref: (TN, K*N)           permuted Cheb stack: L_cat[n, k*N+m] = T_k[n, m]
    x_ref: (N, B*Cin)          node features, batch packed on lanes (resident)
    w_ref: (K, B*Cin, B*Cout)  per-order batch-block-diagonal weights (resident)
    b_ref: (1, B*Cout)         bias tiled per batch, f32 (resident)
    o_ref: (TN, B*Cout)        output row-tile, batch packed on lanes
    r_ref: (K*N, B*Cout)       VMEM scratch holding the stage-A result
    """
    k_order = w_ref.shape[0]
    n_nodes = x_ref.shape[0]

    # Stage A: R[k*N + m, b*Cout + o] = sum_c X[b, m, c] * W[k, c, o]
    # K small matmuls (contraction B*Cin, width B*Cout), f32 MXU accumulation.
    xp = x_ref[...]
    for k in range(k_order):
        r_ref[k * n_nodes:(k + 1) * n_nodes, :] = jnp.dot(
            xp, w_ref[k], preferred_element_type=jnp.float32
        ).astype(r_ref.dtype)

    # Stage B: one big MXU matmul for this row tile, contraction dim K*N.
    acc = jnp.dot(l_ref[...], r_ref[...], preferred_element_type=jnp.float32)
    o_ref[...] = (acc + b_ref[...]).astype(o_ref.dtype)


def _vmem_limit_bytes():
    # 3/4 of physical per-core VMEM (leaves headroom for Mosaic scratch and
    # double buffers): ~48 MiB on v7x, ~96 MiB on v5e/v6e.
    try:
        cap = pltpu.get_tpu_info().vmem_capacity_bytes
    except Exception:
        cap = 64 * 1024 * 1024
    return int(cap * 3) // 4


def cheb_conv_pallas(l_cat, x_pack, w_blk, bias_pack, *, out_dtype, tile_n=512):
    """l_cat: (N, K*N), x_pack: (N, B*Cin), w_blk: (K, B*Cin, B*Cout),
    bias_pack: (1, B*Cout) f32.  Returns out_pack: (N, B*Cout)."""
    n, kn = l_cat.shape
    k_order, bcin, bcout = w_blk.shape
    # Full-N block when small (full-dim blocks are always legal); 8-aligned
    # row tiles when large so L residency + pipelining fit in VMEM.
    tn = n if n <= tile_n else tile_n
    grid = (pl.cdiv(n, tn),)

    return pl.pallas_call(
        _cheb_kernel,
        out_shape=jax.ShapeDtypeStruct((n, bcout), out_dtype),
        grid=grid,
        in_specs=[
            pl.BlockSpec((tn, kn), lambda i: (i, 0)),                   # L row tile
            pl.BlockSpec((n, bcin), lambda i: (0, 0)),                  # x resident
            pl.BlockSpec((k_order, bcin, bcout), lambda i: (0, 0, 0)),  # W resident
            pl.BlockSpec((1, bcout), lambda i: (0, 0)),                 # bias resident
        ],
        out_specs=pl.BlockSpec((tn, bcout), lambda i: (i, 0)),
        scratch_shapes=[pltpu.VMEM((kn, bcout), x_pack.dtype)],
        compiler_params=pltpu.CompilerParams(
            dimension_semantics=("parallel",),      # shard row tiles across TCs
            vmem_limit_bytes=_vmem_limit_bytes(),
        ),
    )(l_cat, x_pack, w_blk, bias_pack)


# ------------------------------ JAX glue -------------------------------------
def get_laplacian(graph, normalize=True):
    # d^{-1/2} scaling without diag matmuls (matches the PyTorch module;
    # zero-degree nodes would still produce inf, as there).
    if normalize:
        d = jnp.sum(graph, axis=-1) ** (-0.5)
        return (jnp.eye(graph.shape[0], dtype=graph.dtype)
                - (d[:, None] * graph) * d[None, :])
    return jnp.diag(jnp.sum(graph, axis=-1)) - graph


def cheb_polynomial(L, K):
    """[K, N, N] with T_0 = I, T_1 = L, T_k = 2 L T_{k-1} - T_{k-2}."""
    N = L.shape[0]
    polys = [jnp.eye(N, dtype=jnp.float32)]
    if K > 1:
        polys.append(L.astype(jnp.float32))
    for _ in range(2, K):
        polys.append(2.0 * (L @ polys[-1]) - polys[-2])
    return jnp.stack(polys, axis=0)


def precompute_cheb_basis(graph, K, normalize=True, compute_dtype=None):
    """(N, K*N) permuted Chebyshev stack: L_cat[n, k*N+m] = T_k[n, m].
    Cache the result when the graph is static."""
    N = graph.shape[0]
    L = get_laplacian(graph, normalize)
    mul_L = cheb_polynomial(L, K)                                  # (K, N, N)
    l_cat = jnp.transpose(mul_L, (1, 0, 2)).reshape(N, K * N)
    if compute_dtype is not None:
        l_cat = l_cat.astype(compute_dtype)
    return l_cat


def precompute_weights(weight, bias, batch, compute_dtype=None):
    """weight: (K, 1, Cin, Cout) -> batch-block-diagonal (K, B*Cin, B*Cout);
    bias: (1, 1, Cout) or None -> (1, B*Cout) f32.  Cacheable per (params, B)."""
    K, _, cin, cout = weight.shape
    w = weight.reshape(K, cin, cout)
    eye_b = jnp.eye(batch, dtype=w.dtype)
    w_blk = jnp.einsum("bd,kco->kbcdo", eye_b, w).reshape(
        K, batch * cin, batch * cout)
    if bias is None:
        bias = jnp.zeros((1, 1, cout), dtype=jnp.float32)
    bias_pack = jnp.tile(bias.reshape(1, cout).astype(jnp.float32), (1, batch))
    if compute_dtype is not None:
        w_blk = w_blk.astype(compute_dtype)
    return w_blk, bias_pack


def cheb_conv_forward(x, graph, weight, bias, normalize=True, compute_dtype=None):
    """x: (B, N, Cin), graph: (N, N), weight: (K, 1, Cin, Cout),
    bias: (1, 1, Cout) or None.  Returns (B, N, Cout).
    compute_dtype=jnp.bfloat16 enables the bf16-MXU / f32-accumulate fast path
    (worthwhile on v5e as well as v6e/v7x); f32 default keeps exact semantics."""
    B, N, Cin = x.shape
    K, _, _, Cout = weight.shape
    l_cat = precompute_cheb_basis(graph, K, normalize, compute_dtype)
    w_blk, bias_pack = precompute_weights(weight, bias, B, compute_dtype)
    x_pack = jnp.transpose(x, (1, 0, 2)).reshape(N, B * Cin)
    if compute_dtype is not None:
        x_pack = x_pack.astype(compute_dtype)
    out_pack = cheb_conv_pallas(l_cat, x_pack, w_blk, bias_pack,
                                out_dtype=x.dtype)
    return jnp.transpose(out_pack.reshape(N, B, Cout), (1, 0, 2))


# ------------------------------ example run ----------------------------------
if __name__ == "__main__":
    B, N, in_c, out_c, K_order = 2, 16, 4, 8, 3   # module K=3 -> 4 Cheb terms
    Kp1 = K_order + 1

    key = jax.random.PRNGKey(0)
    k1, k2, k3 = jax.random.split(key, 3)

    # Node features [B, N, in_c]
    x = jax.random.normal(k1, (B, N, in_c), dtype=jnp.float32)

    # Symmetric positive adjacency with nonzero degrees (finite D^{-1/2})
    a = jax.random.uniform(k2, (N, N), dtype=jnp.float32, minval=0.1, maxval=1.0)
    graph = 0.5 * (a + a.T)

    # Parameters: weight [K+1, 1, in_c, out_c] (xavier_normal-style), bias zeros
    fan_in = 1 * in_c * out_c
    fan_out = Kp1 * in_c * out_c
    std = (2.0 / (fan_in + fan_out)) ** 0.5
    weight = std * jax.random.normal(k3, (Kp1, 1, in_c, out_c), dtype=jnp.float32)
    bias = jnp.zeros((1, 1, out_c), dtype=jnp.float32)

    # f32 path (exact module semantics)
    out = jax.block_until_ready(cheb_conv_forward(x, graph, weight, bias))

    # Pure-JAX reference of the PyTorch semantics
    L = get_laplacian(graph, True)
    mul_L = cheb_polynomial(L, Kp1)                                   # [K, N, N]
    res = jnp.einsum("knm,bmc->kbnc", mul_L, x)                       # [K, B, N, Cin]
    res = jnp.einsum("kbnc,kco->kbno", res, weight[:, 0])             # [K, B, N, Cout]
    ref = jnp.sum(res, axis=0) + bias                                 # [B, N, Cout]

    assert out.shape == (B, N, out_c)
    assert jnp.allclose(out, ref, atol=1e-3, rtol=1e-3)

    # bf16 fast path (recommended for throughput on v5e/v6e/v7x; loose tol
    # because the Chebyshev stack is cast to bf16 -- see correctness note).
    out_bf16 = jax.block_until_ready(
        cheb_conv_forward(x, graph, weight, bias, compute_dtype=jnp.bfloat16))
    assert out_bf16.shape == (B, N, out_c)
    assert jnp.allclose(out_bf16, ref, atol=1e-1, rtol=1e-1)

    print("KERNEL_OK")
</pallas_src>

<mosaic_0001>
module attributes {stable_mosaic.version = 11 : i64} {
  func.func @_cheb_kernel(%arg0: i32, %arg1: memref<16x64xf32, #tpu.memory_space<vmem>>, %arg2: memref<16x8xf32, #tpu.memory_space<vmem>>, %arg3: memref<4x8x16xf32, #tpu.memory_space<vmem>>, %arg4: memref<1x16xf32, #tpu.memory_space<vmem>>, %arg5: memref<16x16xf32, #tpu.memory_space<vmem>>, %arg6: memref<64x16xf32, #tpu.memory_space<vmem>>) attributes {dimension_semantics = [#tpu.dimension_semantics<parallel>], iteration_bounds = array<i64: 1>, scalar_prefetch = 0 : i64, scratch_operands = 1 : i64, tpu.core_type = #tpu.core_type<tc>, window_params = [{transform_indices = @transform_0, window_bounds = array<i64: 16, 64>}, {pipeline_mode = #tpu.pipeline_mode<synchronous>, transform_indices = @transform_1, window_bounds = array<i64: 16, 8>}, {pipeline_mode = #tpu.pipeline_mode<synchronous>, transform_indices = @transform_2, window_bounds = array<i64: 4, 8, 16>}, {pipeline_mode = #tpu.pipeline_mode<synchronous>, transform_indices = @transform_3, window_bounds = array<i64: 1, 16>}, {transform_indices = @transform_4, window_bounds = array<i64: 16, 16>}]} {
    %c0 = arith.constant 0 : index
    %c0_0 = arith.constant 0 : index
    %0 = vector.load %arg2[%c0, %c0_0] : memref<16x8xf32, #tpu.memory_space<vmem>>, vector<16x8xf32>
    %c0_1 = arith.constant 0 : index
    %c0_2 = arith.constant 0 : index
    %c0_3 = arith.constant 0 : index
    %1 = vector.load %arg3[%c0_1, %c0_2, %c0_3] : memref<4x8x16xf32, #tpu.memory_space<vmem>>, vector<1x8x16xf32>
    %2 = vector.shape_cast %1 : vector<1x8x16xf32> to vector<8x16xf32>
    %cst = arith.constant dense<0.000000e+00> : vector<16x16xf32>
    %3 = tpu.matmul %0, %2, %cst {dimension_numbers = #tpu.dot_dimension_numbers<[1], [0], [0], [1], [0, 0, 1, 1], [], []>} : vector<16x8xf32>, vector<8x16xf32>, vector<16x16xf32> -> vector<16x16xf32>
    %c0_4 = arith.constant 0 : index
    %c0_5 = arith.constant 0 : index
    %4 = vector.load %arg6[%c0_4, %c0_5] : memref<64x16xf32, #tpu.memory_space<vmem>>, vector<16x16xf32>
    tpu.vector_store %arg6[%c0_4, %c0_5], %3 {strides = array<i32>} : memref<64x16xf32, #tpu.memory_space<vmem>>, vector<16x16xf32>,
    %c1 = arith.constant 1 : index
    %c0_6 = arith.constant 0 : index
    %c0_7 = arith.constant 0 : index
    %5 = vector.load %arg3[%c1, %c0_6, %c0_7] : memref<4x8x16xf32, #tpu.memory_space<vmem>>, vector<1x8x16xf32>
    %6 = vector.shape_cast %5 : vector<1x8x16xf32> to vector<8x16xf32>
    %cst_8 = arith.constant dense<0.000000e+00> : vector<16x16xf32>
    %7 = tpu.matmul %0, %6, %cst_8 {dimension_numbers = #tpu.dot_dimension_numbers<[1], [0], [0], [1], [0, 0, 1, 1], [], []>} : vector<16x8xf32>, vector<8x16xf32>, vector<16x16xf32> -> vector<16x16xf32>
    %c16 = arith.constant 16 : index
    %c0_9 = arith.constant 0 : index
    %8 = vector.load %arg6[%c16, %c0_9] : memref<64x16xf32, #tpu.memory_space<vmem>>, vector<16x16xf32>
    tpu.vector_store %arg6[%c16, %c0_9], %7 {strides = array<i32>} : memref<64x16xf32, #tpu.memory_space<vmem>>, vector<16x16xf32>,
    %c2 = arith.constant 2 : index
    %c0_10 = arith.constant 0 : index
    %c0_11 = arith.constant 0 : index
    %9 = vector.load %arg3[%c2, %c0_10, %c0_11] : memref<4x8x16xf32, #tpu.memory_space<vmem>>, vector<1x8x16xf32>
    %10 = vector.shape_cast %9 : vector<1x8x16xf32> to vector<8x16xf32>
    %cst_12 = arith.constant dense<0.000000e+00> : vector<16x16xf32>
    %11 = tpu.matmul %0, %10, %cst_12 {dimension_numbers = #tpu.dot_dimension_numbers<[1], [0], [0], [1], [0, 0, 1, 1], [], []>} : vector<16x8xf32>, vector<8x16xf32>, vector<16x16xf32> -> vector<16x16xf32>
    %c32 = arith.constant 32 : index
    %c0_13 = arith.constant 0 : index
    %12 = vector.load %arg6[%c32, %c0_13] : memref<64x16xf32, #tpu.memory_space<vmem>>, vector<16x16xf32>
    tpu.vector_store %arg6[%c32, %c0_13], %11 {strides = array<i32>} : memref<64x16xf32, #tpu.memory_space<vmem>>, vector<16x16xf32>,
    %c3 = arith.constant 3 : index
    %c0_14 = arith.constant 0 : index
    %c0_15 = arith.constant 0 : index
    %13 = vector.load %arg3[%c3, %c0_14, %c0_15] : memref<4x8x16xf32, #tpu.memory_space<vmem>>, vector<1x8x16xf32>
    %14 = vector.shape_cast %13 : vector<1x8x16xf32> to vector<8x16xf32>
    %cst_16 = arith.constant dense<0.000000e+00> : vector<16x16xf32>
    %15 = tpu.matmul %0, %14, %cst_16 {dimension_numbers = #tpu.dot_dimension_numbers<[1], [0], [0], [1], [0, 0, 1, 1], [], []>} : vector<16x8xf32>, vector<8x16xf32>, vector<16x16xf32> -> vector<16x16xf32>
    %c48 = arith.constant 48 : index
    %c0_17 = arith.constant 0 : index
    %16 = vector.load %arg6[%c48, %c0_17] : memref<64x16xf32, #tpu.memory_space<vmem>>, vector<16x16xf32>
    tpu.vector_store %arg6[%c48, %c0_17], %15 {strides = array<i32>} : memref<64x16xf32, #tpu.memory_space<vmem>>, vector<16x16xf32>,
    %c0_18 = arith.constant 0 : index
    %c0_19 = arith.constant 0 : index
    %17 = vector.load %arg1[%c0_18, %c0_19] : memref<16x64xf32, #tpu.memory_space<vmem>>, vector<16x64xf32>
    %c0_20 = arith.constant 0 : index
    %c0_21 = arith.constant 0 : index
    %18 = vector.load %arg6[%c0_20, %c0_21] : memref<64x16xf32, #tpu.memory_space<vmem>>, vector<64x16xf32>
    %cst_22 = arith.constant dense<0.000000e+00> : vector<16x16xf32>
    %19 = tpu.matmul %17, %18, %cst_22 {dimension_numbers = #tpu.dot_dimension_numbers<[1], [0], [0], [1], [0, 0, 1, 1], [], []>} : vector<16x64xf32>, vector<64x16xf32>, vector<16x16xf32> -> vector<16x16xf32>
    %c0_23 = arith.constant 0 : index
    %c0_24 = arith.constant 0 : index
    %20 = vector.load %arg4[%c0_23, %c0_24] : memref<1x16xf32, #tpu.memory_space<vmem>>, vector<1x16xf32>
    %21 = vector.broadcast %20 : vector<1x16xf32> to vector<16x16xf32>
    %22 = arith.addf %19, %21 : vector<16x16xf32>
    %c0_25 = arith.constant 0 : index
    %c0_26 = arith.constant 0 : index
    %23 = vector.load %arg5[%c0_25, %c0_26] : memref<16x16xf32, #tpu.memory_space<vmem>>, vector<16x16xf32>
    tpu.vector_store %arg5[%c0_25, %c0_26], %22 {strides = array<i32>} : memref<16x16xf32, #tpu.memory_space<vmem>>, vector<16x16xf32>,
    return
  }
  func.func @transform_0(%arg0: i32) -> (i32, i32) {
    %c0_i32 = arith.constant 0 : i32
    %c0_i32_0 = arith.constant 0 : i32
    return %arg0, %c0_i32 : i32, i32
  }
  func.func @transform_1(%arg0: i32) -> (i32, i32) {
    %c0_i32 = arith.constant 0 : i32
    %c0_i32_0 = arith.constant 0 : i32
    %c0_i32_1 = arith.constant 0 : i32
    return %c0_i32, %c0_i32_0 : i32, i32
  }
  func.func @transform_2(%arg0: i32) -> (i32, i32, i32) {
    %c0_i32 = arith.constant 0 : i32
    %c0_i32_0 = arith.constant 0 : i32
    %c0_i32_1 = arith.constant 0 : i32
    %c0_i32_2 = arith.constant 0 : i32
    return %c0_i32, %c0_i32_0, %c0_i32_1 : i32, i32, i32
  }
  func.func @transform_3(%arg0: i32) -> (i32, i32) {
    %c0_i32 = arith.constant 0 : i32
    %c0_i32_0 = arith.constant 0 : i32
    %c0_i32_1 = arith.constant 0 : i32
    return %c0_i32, %c0_i32_0 : i32, i32
  }
  func.func @transform_4(%arg0: i32) -> (i32, i32) {
    %c0_i32 = arith.constant 0 : i32
    %c0_i32_0 = arith.constant 0 : i32
    return %arg0, %c0_i32 : i32, i32
  }
}

</mosaic_0001>

<bundles_post_ra>
// kernel: tpu_custom_call.1
= control target key start
LH: loop header
LB: loop body
LE: loop exit
PB: predicated region body
PF: predicated region fallthrough
CT: control target
= control target key end

     0   :  { %9 = vsyncpa [#allocation4], 0  ;;  %s365_s0 = inlined_call_operand.vmem [shape: f32[16,64], index: 0, kind: input, shape index: {}]   ;;  %s366_s1 = inlined_call_operand.vmem [shape: f32[16,8], index: 1, kind: input, shape index: {}]   ;;  %s367_s2 = inlined_call_operand.hbm [shape: f32[4,8,16], index: 2, kind: input, shape index: {}]   ;;  %s368_s3 = inlined_call_operand.vmem [shape: f32[1,16], index: 3, kind: input, shape index: {}]   ;;  %s369_s4 = inlined_call_operand.hbm [shape: f32[16,16], index: 4, kind: output, shape index: {}]  }
   0x1   :  { %10 = vsyncpa [#allocation5], 0  ;;  %s19_s17 = sshll.u32 %s367_s2, 4  ;;  %s291_s18 = smov [#allocation3]   ;;  %s20_s17 = int_to_ptr.hbm [resolvable:$true] %s19_s17 }
   0x2   :  { %s21_s19 = sshll.u32 %s291_s18, 4  ;;  %s292_s20 = smov 128   ;;  %s22_s19 = int_to_ptr.vmem [resolvable:$true] %s21_s19 }
   0x3   :  { %s293_s21 = smov 8  }
   0x4   :  { %27 = dma.hbm_to_vmem [thread:$0]  %s20_s17, 512, %s22_s19, [#allocation4], %s292_s20, %s292_s20, %s293_s21  }
   0x5   :  { %287 = dma.done.wait [#allocation4], 512  }
   0x6   :  { %288 = vsyncadd [#allocation4], 4294966784  ;;  %vm37_vm0 = vcmask 64512   ;;  %v125_v0 = vld [vmem:[#allocation3 + $0x18] sm:$0xff]  ;;  %v34_v1 = vld [vmem:[%s366_s1] sm:$0xff]  ;;  %vm67_vm1 = vcmask 130048  }
   0x7   :  { %v98_v2 = vld [vmem:[#allocation3 + $0x10] sm:$0xff]  ;;  %141 = vmatpush.msra.mxu3 %v125_v0  ;;  %v71_v3 = vld [vmem:[#allocation3 + $0x8] sm:$0xff]  ;;  %v36_v4 = vld [vmem:[#allocation3] sm:$0xff]  ;;  %vm165_vm2 = vcmask 523264   ;;  %s294_s30 = smov [#allocation6]   ;;  %s203_s8 = sshll.u32 %s369_s4, 4  ;;  %s204_s8 = int_to_ptr.hbm [resolvable:$true] %s203_s8 }
   0x8   :  { %114 = vmatpush.msra.mxu2 %v98_v2  ;;  %222 = vmatmul.msk.f32.vlgmr.msra.gmra.mxu3 %vm37_vm0, %v34_v1  ;;  %v35_v5 = vld [vmem:[%s366_s1 + $0x8] sm:$0xff]  ;;  %v151_v21 = vld [vmem:[%s365_s0] sm:$0xff]  ;;  %s201_s5 = sshll.u32 %s294_s30, 4  ;;  %s202_s5 = int_to_ptr.vmem [resolvable:$true] %s201_s5 }
   0x9   :  { %220 = vmatmul.msk.f32.vlgmr.msra.gmra.mxu2 %vm37_vm0, %v34_v1  ;;  %87 = vmatpush.msra.mxu1 %v71_v3  ;;  %v152_v22 = vld [vmem:[%s365_s0 + $0x8] sm:$0xff]  ;;  %v238_v24 = vld [vmem:[%s368_s3] ss:$0 sm:$0xff] }
   0xa   :  { %59 = vmatpush.msra.mxu0 %v36_v4  ;;  %218 = vmatmul.msk.f32.vlgmr.msra.gmra.mxu1 %vm37_vm0, %v34_v1 }
   0xb   :  { %216 = vmatmul.msk.f32.vlgmr.msra.gmra.mxu0 %vm37_vm0, %v34_v1 }
  0x10   :  { %223 = vmatmul.msk.f32.gmra.mxu3 %vm37_vm0, %v35_v5 }
  0x11   :  { %221 = vmatmul.msk.f32.gmra.mxu2 %vm37_vm0, %v35_v5 }
  0x12   :  { %219 = vmatmul.msk.f32.gmra.mxu1 %vm37_vm0, %v35_v5 }
  0x13   :  { %217 = vmatmul.msk.f32.gmra.mxu0 %vm37_vm0, %v35_v5 }
  0x87   :  { %v89_v6 = vpop.f32.mrf.mxu1 }
  0x88   :  { %v61_v7 = vpop.f32.mrf.mxu0  ;;  %95 = vst.msk [vmem:[#allocation2 + $0x10] sm:$0xff] %vm67_vm1, %v89_v6 }
  0x89   :  { %68 = vst.msk [vmem:[#allocation2] sm:$0xff] %vm67_vm1, %v61_v7 }
  0x8b   :  { %v143_v8 = vpop.f32.mrf.mxu3 }
  0x8c   :  { %v116_v9 = vpop.f32.mrf.mxu2  ;;  %149 = vst.msk [vmem:[#allocation2 + $0x30] sm:$0xff] %vm67_vm1, %v143_v8 }
  0x8d   :  { %122 = vst.msk [vmem:[#allocation2 + $0x20] sm:$0xff] %vm67_vm1, %v116_v9 }
  0x8f   :  { %v92_v10 = vpop.f32.mrf.mxu1  ;;  %v155_v19 = vld [vmem:[#allocation2 + $0x10] sm:$0xff] }
  0x90   :  { %v64_v11 = vpop.f32.mrf.mxu0  ;;  %96 = vst.msk [vmem:[#allocation2 + $0x18] sm:$0xff] %vm67_vm1, %v92_v10  ;;  %v153_v23 = vld [vmem:[#allocation2] sm:$0xff] }
  0x91   :  { %69 = vst.msk [vmem:[#allocation2 + $0x8] sm:$0xff] %vm67_vm1, %v64_v11 }
  0x93   :  { %v146_v12 = vpop.f32.mrf.mxu3  ;;  %v159_v15 = vld [vmem:[#allocation2 + $0x30] sm:$0xff] }
  0x94   :  { %v119_v13 = vpop.f32.mrf.mxu2  ;;  %150 = vst.msk [vmem:[#allocation2 + $0x38] sm:$0xff] %vm67_vm1, %v146_v12  ;;  %v157_v17 = vld [vmem:[#allocation2 + $0x20] sm:$0xff] }
  0x95   :  { %123 = vst.msk [vmem:[#allocation2 + $0x28] sm:$0xff] %vm67_vm1, %v119_v13 }
  0x97   :  { %v156_v18 = vld [vmem:[#allocation2 + $0x18] sm:$0xff] }
  0x98   :  { %v154_v20 = vld [vmem:[#allocation2 + $0x8] sm:$0xff] }
  0x9b   :  { %v160_v14 = vld [vmem:[#allocation2 + $0x38] sm:$0xff] }
  0x9c   :  { %180 = vmatpush.msrb.mxu0 %v160_v14  ;;  %226 = vmatpush.msrb.mxu1 %v160_v14  ;;  %v158_v16 = vld [vmem:[#allocation2 + $0x28] sm:$0xff] }
  0x9e   :  { %181 = vmatpush.msrb.mxu0 %v159_v15  ;;  %227 = vmatpush.msrb.mxu1 %v159_v15 }
  0xa0   :  { %182 = vmatpush.msrb.mxu0 %v158_v16  ;;  %228 = vmatpush.msrb.mxu1 %v158_v16 }
  0xa2   :  { %183 = vmatpush.msrb.mxu0 %v157_v17  ;;  %229 = vmatpush.msrb.mxu1 %v157_v17 }
  0xa4   :  { %184 = vmatpush.msrb.mxu0 %v156_v18  ;;  %230 = vmatpush.msrb.mxu1 %v156_v18 }
  0xa6   :  { %185 = vmatpush.msrb.mxu0 %v155_v19  ;;  %231 = vmatpush.msrb.mxu1 %v155_v19 }
  0xa8   :  { %186 = vmatpush.msrb.mxu0 %v154_v20  ;;  %232 = vmatpush.msrb.mxu1 %v154_v20 }
  0xaa   :  { %187 = vmatpush.msrb.mxu0 %v153_v23  ;;  %233 = vmatpush.msrb.mxu1 %v153_v23 }
  0xab   :  { %224 = vmatmul.msk.f32.vlgmr.msrb.gmra.mxu0 %vm165_vm2, %v151_v21  ;;  %225 = vmatmul.msk.f32.vlgmr.msrb.gmra.mxu1 %vm165_vm2, %v152_v22 }
 0x128   :  { %v189_v25 = vpop.f32.mrf.mxu0  ;;  %v192_v26 = vpop.f32.mrf.mxu1 }
 0x129   :  { %v190_v27 = vadd.f32 %v238_v24, %v189_v25  ;;  %v193_v28 = vadd.f32 %v238_v24, %v192_v26 }
 0x12b   :  { %195 = vst.msk [vmem:[#allocation6] sm:$0xff] %vm67_vm1, %v190_v27 }
 0x12c   :  { %196 = vst.msk [vmem:[#allocation6 + $0x8] sm:$0xff] %vm67_vm1, %v193_v28 }
 0x12d   :  { %209 = dma.vmem_to_hbm [thread:$0]  %s202_s5, 256, %s204_s8, [#allocation5], %s292_s20, %s292_s20, %s293_s21  }
 0x12e   :  { %289 = dma.done.wait [#allocation5], 256  }
 0x12f   :  { %290 = vsyncadd [#allocation5], 4294967040 }
 0x130   :  { %214 = vsyncpa [#allocation4], 1 }
 0x131   :  { %215 = vsyncpa [#allocation5], 1 }

</bundles_post_ra>
